<compile_context>
chip_gen: v6e
topology: v6e:2x2x1
jax: 0.10.0
libtpu: 0.0.40
codegen_flags: <defaults>
</compile_context>

<pallas_src>
import functools

import jax
import jax.numpy as jnp
from jax.experimental import pallas as pl
from jax.experimental.pallas import tpu as pltpu

LANES = 128
SUBLANES = 8
CHUNK_ROWS = 1024          # rows processed per inner-loop iteration (512 KiB f32)
IGNORE_VALUE = 255         # pad value for the target tail (neither pos nor neg)

_TUNE_CACHE = None


def _tpu_tuning():
    """Generation-specific tile / VMEM / core-split choices."""
    global _TUNE_CACHE
    if _TUNE_CACHE is not None:
        return _TUNE_CACHE
    vmem = None
    try:
        info = pltpu.get_tpu_info()
        vmem = getattr(info, "vmem_capacity_bytes", None)
    except Exception:
        vmem = None
    if vmem is not None and vmem >= 96 * 1024 * 1024:
        # v5e / v6e: 128 MiB VMEM, single TensorCore, HBM-bound -> big tiles,
        # no core split (a size-2 "parallel" axis is just a sequential loop
        # there and can re-DMA a duplicate tile when nblocks is odd).
        _TUNE_CACHE = dict(max_tile_rows=16384,
                           vmem_limit=64 * 1024 * 1024,
                           core_splits=1)
    else:
        # v7x (64 MiB VMEM per TC, 2 TCs) or unknown: moderate tiles, keep the
        # leading "parallel" axis for 2-TensorCore sharding.
        # TODO(synk): verify on v7x (xprof) that the leading "parallel" axis
        # really shards across both TensorCores; if not, switch it to
        # pltpu.CORE_PARALLEL.
        _TUNE_CACHE = dict(max_tile_rows=8192,
                           vmem_limit=32 * 1024 * 1024,
                           core_splits=2)
    return _TUNE_CACHE


def _boundary_loss_kernel(pred_ref, tgt_ref, acc_ref, *,
                          tile_rows, chunk_rows, steps_per_core,
                          nblocks, rows_in_last, guard_overshoot):
    # acc_ref: (1, 4, 8, 128) f32, resident across the inner ("arbitrary") axis.
    @pl.when(pl.program_id(1) == 0)
    def _init():
        acc_ref[...] = jnp.zeros_like(acc_ref)

    step = pl.program_id(0) * steps_per_core + pl.program_id(1)

    def process(row_start, nrows):
        # nrows is a static Python int (multiple of 8).
        x = pred_ref[pl.ds(row_start, nrows), :].astype(jnp.float32)
        t = tgt_ref[pl.ds(row_start, nrows), :].astype(jnp.float32)
        pos = t == 1.0
        neg = t == 0.0
        # Numerically stable BCE-with-logits, split by effective target:
        #   y=1: relu(-x) + log1p(exp(-|x|));  y=0: relu(x) + log1p(exp(-|x|)).
        sp = jnp.log1p(jnp.exp(-jnp.abs(x)))
        bce_pos = jnp.where(pos, sp + jnp.maximum(-x, 0.0), 0.0)
        bce_neg = jnp.where(neg, sp + jnp.maximum(x, 0.0), 0.0)

        def fold(v):
            # Reduce to a vreg-shaped (8,128) partial: pure VPU adds.
            return jnp.sum(v.reshape(nrows // SUBLANES, SUBLANES, LANES), axis=0)

        acc_ref[0, 0] += fold(pos.astype(jnp.float32))
        acc_ref[0, 1] += fold(neg.astype(jnp.float32))
        acc_ref[0, 2] += fold(bce_pos)
        acc_ref[0, 3] += fold(bce_neg)

    def run_block(nrows):
        # nrows static; iterate over chunk_rows sub-chunks to bound live
        # VMEM/vreg intermediates regardless of tile size.
        n_full = nrows // chunk_rows
        rem = nrows - n_full * chunk_rows
        if n_full > 0:
            def body(ci, carry):
                start = pl.multiple_of(ci * chunk_rows, chunk_rows)
                process(start, chunk_rows)
                return carry
            jax.lax.fori_loop(0, n_full, body, 0)
        if rem > 0:
            process(n_full * chunk_rows, rem)

    partial_tail = rows_in_last != tile_rows
    last = nblocks - 1

    if partial_tail:
        # Full blocks (skipping any clamped/duplicated overshoot step).
        @pl.when(jnp.logical_and(step < nblocks, step != last))
        def _full():
            run_block(tile_rows)

        # Tail block: statically process only the valid rows -> no mask.
        @pl.when(step == last)
        def _tail():
            run_block(rows_in_last)
    elif guard_overshoot:
        @pl.when(step < nblocks)
        def _full():
            run_block(tile_rows)
    else:
        run_block(tile_rows)


@functools.partial(jax.jit, static_argnames=("loss_weight",))
def boundary_loss(bd_pre, bd_gt, loss_weight=1.0):
    """Pallas implementation of BoundaryLoss.forward.

    bd_pre: (N, 1, H, W) boundary logits (NCHW), any float dtype
    bd_gt:  (N, H, W)    targets with values in {0, 1, ignore(255)}; any dtype
                         (uint8 / bf16 / f32) -- upcast happens in-kernel.
    """
    tune = _tpu_tuning()

    n, c, h, w = bd_pre.shape
    assert c == 1, "BoundaryLoss expects a single boundary-logit channel"
    num_elems = n * h * w

    # C == 1 => permute(0,2,3,1).view(-1) is just a flatten: no transpose copy.
    pred = bd_pre.reshape(-1)
    tgt = bd_gt.reshape(-1)

    # Lane-dense 2-D layout.  Pad only if the element count is not already a
    # multiple of one (8,128) vreg tile; target pad uses the IGNORE value so
    # padded pixels are neither positive nor negative (no in-kernel mask).
    subtile = SUBLANES * LANES
    padded = ((num_elems + subtile - 1) // subtile) * subtile
    if padded != num_elems:
        pad = padded - num_elems
        pred = jnp.pad(pred, (0, pad))
        tgt = jnp.pad(tgt, (0, pad), constant_values=IGNORE_VALUE)
    rows = padded // LANES
    pred2d = pred.reshape(rows, LANES)
    tgt2d = tgt.reshape(rows, LANES)

    tile_rows = min(tune["max_tile_rows"], rows)      # both multiples of 8
    nblocks = (rows + tile_rows - 1) // tile_rows
    num_core_splits = tune["core_splits"] if nblocks > 1 else 1
    steps_per_core = (nblocks + num_core_splits - 1) // num_core_splits
    guard_overshoot = num_core_splits * steps_per_core > nblocks
    rows_in_last = rows - (nblocks - 1) * tile_rows   # static, multiple of 8
    last_block = nblocks - 1

    def in_index(cidx, i):
        # Clamp so the DMA never targets a block wholly outside the array; the
        # scalar step<nblocks guard in the kernel skips such duplicated steps.
        return (jnp.minimum(cidx * steps_per_core + i, last_block), 0)

    kernel = functools.partial(
        _boundary_loss_kernel,
        tile_rows=tile_rows,
        chunk_rows=CHUNK_ROWS,
        steps_per_core=steps_per_core,
        nblocks=nblocks,
        rows_in_last=rows_in_last,
        guard_overshoot=guard_overshoot)

    bytes_accessed = (int(pred2d.size) * pred2d.dtype.itemsize
                      + int(tgt2d.size) * tgt2d.dtype.itemsize
                      + num_core_splits * 4 * SUBLANES * LANES * 4)

    acc = pl.pallas_call(
        kernel,
        out_shape=jax.ShapeDtypeStruct(
            (num_core_splits, 4, SUBLANES, LANES), jnp.float32),
        grid_spec=pltpu.PrefetchScalarGridSpec(
            num_scalar_prefetch=0,
            grid=(num_core_splits, steps_per_core),
            in_specs=[
                pl.BlockSpec((tile_rows, LANES), in_index),
                pl.BlockSpec((tile_rows, LANES), in_index),
            ],
            out_specs=pl.BlockSpec((1, 4, SUBLANES, LANES),
                                   lambda cidx, i: (cidx, 0, 0, 0)),
        ),
        compiler_params=pltpu.CompilerParams(
            dimension_semantics=("parallel", "arbitrary"),
            vmem_limit_bytes=tune["vmem_limit"],
        ),
        cost_estimate=pl.CostEstimate(
            flops=12 * num_elems,
            transcendentals=2 * num_elems,
            bytes_accessed=bytes_accessed),
    )(pred2d, tgt2d)

    sums = jnp.sum(acc, axis=(0, 2, 3))  # (4,)
    pos_num, neg_num, pos_bce, neg_bce = sums[0], sums[1], sums[2], sums[3]
    sum_num = pos_num + neg_num

    # weight[pos]=neg_num/sum_num, weight[neg]=pos_num/sum_num, else 0;
    # reduction='mean' divides by the total (unpadded) element count.
    weighted_sum = (neg_num / sum_num) * pos_bce + (pos_num / sum_num) * neg_bce
    loss = weighted_sum / jnp.float32(num_elems)
    return jnp.float32(loss_weight) * loss


def boundary_loss_ref(bd_pre, bd_gt, loss_weight=1.0):
    """Pure-JAX reference matching the PyTorch forward exactly."""
    log_p = jnp.transpose(bd_pre, (0, 2, 3, 1)).reshape(1, -1).astype(jnp.float32)
    t = bd_gt.reshape(1, -1).astype(jnp.float32)
    pos = t == 1.0
    neg = t == 0.0
    pos_num = jnp.sum(pos)
    neg_num = jnp.sum(neg)
    sum_num = pos_num + neg_num
    weight = jnp.where(pos, neg_num / sum_num,
                       jnp.where(neg, pos_num / sum_num, 0.0)).astype(jnp.float32)
    bce = jnp.maximum(log_p, 0.0) - log_p * t + jnp.log1p(jnp.exp(-jnp.abs(log_p)))
    return jnp.float32(loss_weight) * jnp.mean(weight * bce)


if __name__ == "__main__":
    key = jax.random.PRNGKey(0)
    k_pre, k_gt = jax.random.split(key)

    N, C, H, W = 2, 1, 16, 16
    bd_pre = jax.random.normal(k_pre, (N, C, H, W), dtype=jnp.float32)

    # Ground truth: mix of boundary (1), background (0), and ignore (255).
    r = jax.random.randint(k_gt, (N, H, W), 0, 10)
    bd_gt = jnp.where(r < 3, 1.0, jnp.where(r < 9, 0.0, 255.0)).astype(jnp.float32)

    loss = boundary_loss(bd_pre, bd_gt, loss_weight=1.0)
    jax.block_until_ready(loss)

    ref = boundary_loss_ref(bd_pre, bd_gt, loss_weight=1.0)
    assert jnp.allclose(loss, ref, rtol=1e-5, atol=1e-6), (loss, ref)

    print("KERNEL_OK")
</pallas_src>

<mosaic_0001>
module attributes {stable_mosaic.version = 11 : i64} {
  func.func @_boundary_loss_kernel(%arg0: i32, %arg1: i32, %arg2: memref<8x128xf32, #tpu.memory_space<vmem>>, %arg3: memref<8x128xf32, #tpu.memory_space<vmem>>, %arg4: memref<1x4x8x128xf32, #tpu.memory_space<vmem>>) attributes {dimension_semantics = [#tpu.dimension_semantics<parallel>, #tpu.dimension_semantics<arbitrary>], iteration_bounds = array<i64: 1, 1>, scalar_prefetch = 0 : i64, scratch_operands = 0 : i64, tpu.core_type = #tpu.core_type<tc>, window_params = [{transform_indices = @transform_0, window_bounds = array<i64: 8, 128>}, {transform_indices = @transform_1, window_bounds = array<i64: 8, 128>}, {transform_indices = @transform_2, window_bounds = array<i64: 1, 4, 8, 128>}]} {
    %c0_i32 = arith.constant 0 : i32
    %0 = arith.cmpi eq, %arg1, %c0_i32 : i32
    %1 = arith.extui %0 : i1 to i32
    %c0_i32_0 = arith.constant 0 : i32
    %2 = arith.cmpi ne, %1, %c0_i32_0 : i32
    scf.if %2 {
      %cst_44 = arith.constant 0.000000e+00 : f32
      %62 = vector.broadcast %cst_44 : f32 to vector<1x4x8x128xf32>
      %c0_45 = arith.constant 0 : index
      %c0_46 = arith.constant 0 : index
      %c0_47 = arith.constant 0 : index
      %c0_48 = arith.constant 0 : index
      %63 = vector.load %arg4[%c0_45, %c0_46, %c0_47, %c0_48] : memref<1x4x8x128xf32, #tpu.memory_space<vmem>>, vector<1x4x8x128xf32>
      tpu.vector_store %arg4[%c0_45, %c0_46, %c0_47, %c0_48], %62 {strides = array<i32>} : memref<1x4x8x128xf32, #tpu.memory_space<vmem>>, vector<1x4x8x128xf32>,
    } else {
    }
    %c0 = arith.constant 0 : index
    %c0_1 = arith.constant 0 : index
    %3 = vector.load %arg2[%c0, %c0_1] : memref<8x128xf32, #tpu.memory_space<vmem>>, vector<8x128xf32>
    %c0_2 = arith.constant 0 : index
    %c0_3 = arith.constant 0 : index
    %4 = vector.load %arg3[%c0_2, %c0_3] : memref<8x128xf32, #tpu.memory_space<vmem>>, vector<8x128xf32>
    %cst = arith.constant 1.000000e+00 : f32
    %5 = vector.broadcast %cst : f32 to vector<8x128xf32>
    %6 = arith.cmpf oeq, %4, %5 : vector<8x128xf32>
    %cst_4 = arith.constant 0.000000e+00 : f32
    %7 = vector.broadcast %cst_4 : f32 to vector<8x128xf32>
    %8 = arith.cmpf oeq, %4, %7 : vector<8x128xf32>
    %9 = math.absf %3 : vector<8x128xf32>
    %cst_5 = arith.constant 0.000000e+00 : f32
    %10 = vector.broadcast %cst_5 : f32 to vector<8x128xf32>
    %11 = arith.subf %10, %9 : vector<8x128xf32>
    %12 = math.exp %11 : vector<8x128xf32>
    %13 = math.log1p %12 : vector<8x128xf32>
    %cst_6 = arith.constant 0.000000e+00 : f32
    %14 = vector.broadcast %cst_6 : f32 to vector<8x128xf32>
    %15 = arith.subf %14, %3 : vector<8x128xf32>
    %cst_7 = arith.constant 0.000000e+00 : f32
    %16 = vector.broadcast %cst_7 : f32 to vector<8x128xf32>
    %17 = arith.maximumf %15, %16 : vector<8x128xf32>
    %18 = arith.addf %13, %17 : vector<8x128xf32>
    %cst_8 = arith.constant 0.000000e+00 : f32
    %19 = vector.broadcast %cst_8 : f32 to vector<8x128xf32>
    %20 = arith.select %6, %18, %19 : vector<8x128xi1>, vector<8x128xf32>
    %cst_9 = arith.constant 0.000000e+00 : f32
    %21 = vector.broadcast %cst_9 : f32 to vector<8x128xf32>
    %22 = arith.maximumf %3, %21 : vector<8x128xf32>
    %23 = arith.addf %13, %22 : vector<8x128xf32>
    %cst_10 = arith.constant 0.000000e+00 : f32
    %24 = vector.broadcast %cst_10 : f32 to vector<8x128xf32>
    %25 = arith.select %8, %23, %24 : vector<8x128xi1>, vector<8x128xf32>
    %c0_11 = arith.constant 0 : index
    %c0_12 = arith.constant 0 : index
    %c0_13 = arith.constant 0 : index
    %c0_14 = arith.constant 0 : index
    %26 = vector.load %arg4[%c0_11, %c0_12, %c0_13, %c0_14] : memref<1x4x8x128xf32, #tpu.memory_space<vmem>>, vector<1x1x8x128xf32>
    %27 = vector.shape_cast %26 : vector<1x1x8x128xf32> to vector<8x128xf32>
    %28 = arith.extui %6 : vector<8x128xi1> to vector<8x128xi32>
    %29 = arith.sitofp %28 : vector<8x128xi32> to vector<8x128xf32>
    %30 = vector.shape_cast %29 : vector<8x128xf32> to vector<1x8x128xf32>
    %cst_15 = arith.constant dense<0.000000e+00> : vector<8x128xf32>
    %31 = vector.multi_reduction <add>, %30, %cst_15 [0] : vector<1x8x128xf32> to vector<8x128xf32>
    %32 = arith.addf %27, %31 : vector<8x128xf32>
    %c0_16 = arith.constant 0 : index
    %c0_17 = arith.constant 0 : index
    %c0_18 = arith.constant 0 : index
    %c0_19 = arith.constant 0 : index
    %33 = vector.load %arg4[%c0_16, %c0_17, %c0_18, %c0_19] : memref<1x4x8x128xf32, #tpu.memory_space<vmem>>, vector<1x1x8x128xf32>
    %34 = vector.shape_cast %33 : vector<1x1x8x128xf32> to vector<8x128xf32>
    %35 = vector.shape_cast %32 : vector<8x128xf32> to vector<1x1x8x128xf32>
    tpu.vector_store %arg4[%c0_16, %c0_17, %c0_18, %c0_19], %35 {strides = array<i32>} : memref<1x4x8x128xf32, #tpu.memory_space<vmem>>, vector<1x1x8x128xf32>,
    %c0_20 = arith.constant 0 : index
    %c1 = arith.constant 1 : index
    %c0_21 = arith.constant 0 : index
    %c0_22 = arith.constant 0 : index
    %36 = vector.load %arg4[%c0_20, %c1, %c0_21, %c0_22] : memref<1x4x8x128xf32, #tpu.memory_space<vmem>>, vector<1x1x8x128xf32>
    %37 = vector.shape_cast %36 : vector<1x1x8x128xf32> to vector<8x128xf32>
    %38 = arith.extui %8 : vector<8x128xi1> to vector<8x128xi32>
    %39 = arith.sitofp %38 : vector<8x128xi32> to vector<8x128xf32>
    %40 = vector.shape_cast %39 : vector<8x128xf32> to vector<1x8x128xf32>
    %cst_23 = arith.constant dense<0.000000e+00> : vector<8x128xf32>
    %41 = vector.multi_reduction <add>, %40, %cst_23 [0] : vector<1x8x128xf32> to vector<8x128xf32>
    %42 = arith.addf %37, %41 : vector<8x128xf32>
    %c0_24 = arith.constant 0 : index
    %c1_25 = arith.constant 1 : index
    %c0_26 = arith.constant 0 : index
    %c0_27 = arith.constant 0 : index
    %43 = vector.load %arg4[%c0_24, %c1_25, %c0_26, %c0_27] : memref<1x4x8x128xf32, #tpu.memory_space<vmem>>, vector<1x1x8x128xf32>
    %44 = vector.shape_cast %43 : vector<1x1x8x128xf32> to vector<8x128xf32>
    %45 = vector.shape_cast %42 : vector<8x128xf32> to vector<1x1x8x128xf32>
    tpu.vector_store %arg4[%c0_24, %c1_25, %c0_26, %c0_27], %45 {strides = array<i32>} : memref<1x4x8x128xf32, #tpu.memory_space<vmem>>, vector<1x1x8x128xf32>,
    %c0_28 = arith.constant 0 : index
    %c2 = arith.constant 2 : index
    %c0_29 = arith.constant 0 : index
    %c0_30 = arith.constant 0 : index
    %46 = vector.load %arg4[%c0_28, %c2, %c0_29, %c0_30] : memref<1x4x8x128xf32, #tpu.memory_space<vmem>>, vector<1x1x8x128xf32>
    %47 = vector.shape_cast %46 : vector<1x1x8x128xf32> to vector<8x128xf32>
    %48 = vector.shape_cast %20 : vector<8x128xf32> to vector<1x8x128xf32>
    %cst_31 = arith.constant dense<0.000000e+00> : vector<8x128xf32>
    %49 = vector.multi_reduction <add>, %48, %cst_31 [0] : vector<1x8x128xf32> to vector<8x128xf32>
    %50 = arith.addf %47, %49 : vector<8x128xf32>
    %c0_32 = arith.constant 0 : index
    %c2_33 = arith.constant 2 : index
    %c0_34 = arith.constant 0 : index
    %c0_35 = arith.constant 0 : index
    %51 = vector.load %arg4[%c0_32, %c2_33, %c0_34, %c0_35] : memref<1x4x8x128xf32, #tpu.memory_space<vmem>>, vector<1x1x8x128xf32>
    %52 = vector.shape_cast %51 : vector<1x1x8x128xf32> to vector<8x128xf32>
    %53 = vector.shape_cast %50 : vector<8x128xf32> to vector<1x1x8x128xf32>
    tpu.vector_store %arg4[%c0_32, %c2_33, %c0_34, %c0_35], %53 {strides = array<i32>} : memref<1x4x8x128xf32, #tpu.memory_space<vmem>>, vector<1x1x8x128xf32>,
    %c0_36 = arith.constant 0 : index
    %c3 = arith.constant 3 : index
    %c0_37 = arith.constant 0 : index
    %c0_38 = arith.constant 0 : index
    %54 = vector.load %arg4[%c0_36, %c3, %c0_37, %c0_38] : memref<1x4x8x128xf32, #tpu.memory_space<vmem>>, vector<1x1x8x128xf32>
    %55 = vector.shape_cast %54 : vector<1x1x8x128xf32> to vector<8x128xf32>
    %56 = vector.shape_cast %25 : vector<8x128xf32> to vector<1x8x128xf32>
    %cst_39 = arith.constant dense<0.000000e+00> : vector<8x128xf32>
    %57 = vector.multi_reduction <add>, %56, %cst_39 [0] : vector<1x8x128xf32> to vector<8x128xf32>
    %58 = arith.addf %55, %57 : vector<8x128xf32>
    %c0_40 = arith.constant 0 : index
    %c3_41 = arith.constant 3 : index
    %c0_42 = arith.constant 0 : index
    %c0_43 = arith.constant 0 : index
    %59 = vector.load %arg4[%c0_40, %c3_41, %c0_42, %c0_43] : memref<1x4x8x128xf32, #tpu.memory_space<vmem>>, vector<1x1x8x128xf32>
    %60 = vector.shape_cast %59 : vector<1x1x8x128xf32> to vector<8x128xf32>
    %61 = vector.shape_cast %58 : vector<8x128xf32> to vector<1x1x8x128xf32>
    tpu.vector_store %arg4[%c0_40, %c3_41, %c0_42, %c0_43], %61 {strides = array<i32>} : memref<1x4x8x128xf32, #tpu.memory_space<vmem>>, vector<1x1x8x128xf32>,
    return
  }
  func.func @transform_0(%arg0: i32, %arg1: i32) -> (i32, i32) {
    %c1_i32 = arith.constant 1 : i32
    %0 = arith.muli %arg0, %c1_i32 : i32
    %1 = arith.addi %0, %arg1 : i32
    %c0_i32 = arith.constant 0 : i32
    %2 = arith.minsi %1, %c0_i32 : i32
    %c0_i32_0 = arith.constant 0 : i32
    %c0_i32_1 = arith.constant 0 : i32
    return %2, %c0_i32_0 : i32, i32
  }
  func.func @transform_1(%arg0: i32, %arg1: i32) -> (i32, i32) {
    %c1_i32 = arith.constant 1 : i32
    %0 = arith.muli %arg0, %c1_i32 : i32
    %1 = arith.addi %0, %arg1 : i32
    %c0_i32 = arith.constant 0 : i32
    %2 = arith.minsi %1, %c0_i32 : i32
    %c0_i32_0 = arith.constant 0 : i32
    %c0_i32_1 = arith.constant 0 : i32
    return %2, %c0_i32_0 : i32, i32
  }
  func.func @transform_2(%arg0: i32, %arg1: i32) -> (i32, i32, i32, i32) {
    %c0_i32 = arith.constant 0 : i32
    %c0_i32_0 = arith.constant 0 : i32
    %c0_i32_1 = arith.constant 0 : i32
    %c0_i32_2 = arith.constant 0 : i32
    return %arg0, %c0_i32, %c0_i32_0, %c0_i32_1 : i32, i32, i32, i32
  }
}

</mosaic_0001>

<bundles_post_ra>
// kernel: boundary_loss.1
= control target key start
LH: loop header
LB: loop body
LE: loop exit
PB: predicated region body
PF: predicated region fallthrough
CT: control target
= control target key end

     0   :  { %v149_v3 = vmov 0.0   ;;  %s187_s1 = inlined_call_operand.vmem [shape: f32[8,128], index: 1, kind: input, shape index: {}]   ;;  %s188_s0 = inlined_call_operand.vmem [shape: f32[8,128], index: 0, kind: input, shape index: {}]   ;;  %s189_s2 = inlined_call_operand.vmem [shape: f32[1,4,8,128], index: 2, kind: output, shape index: {}]  }
   0x1   :  { %v74_v0 = vld [vmem:[%s187_s1] sm:$0xff] }
   0x2   :  { %v73_v1 = vld [vmem:[%s188_s0] sm:$0xff]  ;;  %vm75_vm0 = vcmp.eq.f32.partialorder %v74_v0, 1.0  ;;  %vm76_vm1 = vcmp.eq.f32.partialorder %v74_v0, 0.0 }
   0x3   :  { %v77_v2 = vand.u32 2147483647, %v73_v1  ;;  %v136_v4 = vsel %vm75_vm0, 1.0, %v149_v3  ;;  %v138_v5 = vsel %vm76_vm1, 1.0, %v149_v3  ;;  %v90_v13 = vsub.f32 0.0, %v73_v1 }
   0x4   :  { %102 = vst [vmem:[%s189_s2] sm:$0xff] %v136_v4  ;;  %139 = vst [vmem:[%s189_s2 + $0x8] sm:$0xff] %v138_v5  ;;  %v94_v17 = vmax.f32 %v73_v1, 0.0 }
   0x5   :  { %v78_v6 = vsub.f32 0.0, %v77_v2  ;;  %v91_v16 = vmax.f32 %v90_v13, 0.0 }
   0x7   :  { %v79_v7 = vmul.f32 1.442695, %v78_v6 }
   0x9   :  { %145 = vpow2.f32 %v79_v7 }
  0x16   :  { %v146_v8 = vpop.eup %145 }
  0x17   :  { %v81_v9 = vadd.f32 1.0, %v146_v8  ;;  %v84_v10 = vmul.f32 -0.5, %v146_v8  ;;  %v87_v12 = vand.u32 2147483647, %v146_v8 }
  0x19   :  { %147 = vlog2.f32 %v81_v9  ;;  %v85_v11 = vadd.f32 1.0, %v84_v10  ;;  %vm88_vm2 = vcmp.lt.f32.partialorder %v87_v12, 0.0004427343 }
  0x1b   :  { %v86_v14 = vmul.f32 %v146_v8, %v85_v11 }
  0x26   :  { %v148_v15 = vpop.eup %147 }
  0x27   :  { %v83_v18 = vmul.f32 0.6931472, %v148_v15 }
  0x29   :  { %v89_v19 = vsel %vm88_vm2, %v86_v14, %v83_v18 }
  0x2a   :  { %v92_v20 = vadd.f32 %v91_v16, %v89_v19  ;;  %v95_v21 = vadd.f32 %v94_v17, %v89_v19 }
  0x2c   :  { %v93_v22 = vsel %vm75_vm0, %v92_v20, 0.0  ;;  %v96_v23 = vsel %vm76_vm1, %v95_v21, 0.0 }
  0x2d   :  { %141 = vst [vmem:[%s189_s2 + $0x10] sm:$0xff] %v93_v22  ;;  %143 = vst [vmem:[%s189_s2 + $0x18] sm:$0xff] %v96_v23 }

</bundles_post_ra>
